<compile_context>
chip_gen: v7x
topology: tpu7x:2x2x1
jax: 0.10.0
libtpu: 0.0.40
codegen_flags: <defaults>
</compile_context>

<pallas_src>
import math

import jax
import jax.numpy as jnp
import numpy as np
from jax.experimental import pallas as pl
from jax.experimental.pallas import tpu as pltpu


def _enet_simple_kernel(x_ref, wpat_ref, g_ref, out_ref):
    # x_ref:    (1, CF, s_tile)  base functions; samples on the lane axis.
    # wpat_ref: (1, CF, s_tile)  per-lane softmax weights (tile-invariant per batch).
    # g_ref:    (C, CF)          0/1 grouping matrix (sums F per class).
    # out_ref:  (1, C, s_tile)   weighted class sums, lane-dense.
    prod = x_ref[0] * wpat_ref[0]                              # VPU, native dtype
    out_ref[0] = jnp.dot(g_ref[...], prod,                     # MXU F-group reduce
                         preferred_element_type=jnp.float32).astype(out_ref.dtype)


def enet_simple_forward(x, weight, *, vmem_budget_bytes=32 * 1024 * 1024):
    """ENetSimple.forward (dropout_rate == 0 / eval path) via a Pallas TPU kernel.

    Returns (out, w_norm) with out: (B, S, C), w_norm: (B, S, C, F).
    """
    B, S, C, F = x.shape
    D = weight.shape[0]
    # torch's (S, output_dim) -> (B, S, -1) -> (B, S, C, F) reshapes require this.
    assert D == B * C * F, "output_dim must equal batch*classes*base_functions"
    CF = C * F
    dtype = x.dtype

    # TODO(synk): the dropout/training branch references self.omit_output_mask,
    # which is never defined in __init__ (it would raise in torch); only the
    # dropout_rate == 0 / eval semantics are implemented.

    # ---- Tiny glue math (wrapper, XLA) --------------------------------------
    # The scrambled logit tensor holds only B distinct rows:
    #   w[b, s, :] = weight.reshape(B, CF)[(b*S + s) % B]
    # Softmax those B rows once here instead of every grid step in the kernel.
    rows = jax.nn.softmax(weight.reshape(B, CF).astype(jnp.float32), axis=-1)  # (B, CF)

    # Full w_norm required by the module API (pure layout plumbing / gather).
    idx = (jnp.arange(B)[:, None] * S + jnp.arange(S)[None, :]) % B            # (B, S)
    w_norm = rows[idx].reshape(B, S, C, F).astype(weight.dtype)

    # ---- Tile sizing (explicit double-buffered VMEM footprint) --------------
    itemsize = jnp.dtype(dtype).itemsize
    CF_sub = -(-CF // 8) * 8                      # sublane-padded CF
    unit = (128 * B) // math.gcd(128, B)          # lcm(128, B): lane- & phase-aligned
    # per-lane bytes: x (x2 buffers) + weight pattern (x2) + out (C padded to 8, x2)
    bytes_per_lane = (2 * CF_sub + 2 * CF_sub + 2 * 8) * itemsize
    budget = max(int(vmem_budget_bytes), unit * bytes_per_lane)
    s_tile = (budget // bytes_per_lane) // unit * unit
    s_needed = -(-S // unit) * unit
    s_tile = max(unit, min(s_tile, s_needed))
    n_t = -(-S // s_tile)
    S_pad = n_t * s_tile

    footprint = (4 * CF_sub * s_tile + 2 * 8 * s_tile + 2 * 8 * 128) * itemsize
    # Footprint-derived limit: large tiles on v5e/v6e (128 MiB), safe on v7x (64 MiB).
    vmem_limit = int(min(48 * 2**20, max(footprint + (8 << 20), 16 << 20)))

    # ---- Layout prep: samples on lanes --------------------------------------
    x_t = jnp.transpose(x.reshape(B, S, CF), (0, 2, 1))        # (B, CF, S)
    if S_pad != S:
        x_t = jnp.pad(x_t, ((0, 0), (0, 0), (0, S_pad - S)))   # (B, CF, S_pad)

    # Per-lane weight pattern, tile-invariant per batch (s_tile % B == 0), so
    #   sample s = t*s_tile + lane  needs row (b*S + lane) % B for every tile t.
    lane_idx = (jnp.arange(B)[:, None] * S + jnp.arange(s_tile)[None, :]) % B  # (B, s_tile)
    w_pat = jnp.transpose(rows[lane_idx], (0, 2, 1)).astype(dtype)             # (B, CF, s_tile)

    # Constant 0/1 grouping matrix: g[c, k] = 1 iff k // F == c.
    g = (jax.lax.broadcasted_iota(jnp.int32, (C, CF), 1) // F
         == jax.lax.broadcasted_iota(jnp.int32, (C, CF), 0)).astype(dtype)     # (C, CF)

    out_t = pl.pallas_call(
        _enet_simple_kernel,
        out_shape=jax.ShapeDtypeStruct((B, C, S_pad), dtype),
        grid_spec=pltpu.PrefetchScalarGridSpec(
            num_scalar_prefetch=0,
            grid=(B, n_t),
            in_specs=[
                pl.BlockSpec((1, CF, s_tile), lambda b, t: (b, 0, t)),
                pl.BlockSpec((1, CF, s_tile), lambda b, t: (b, 0, 0)),
                pl.BlockSpec((C, CF), lambda b, t: (0, 0)),
            ],
            out_specs=pl.BlockSpec((1, C, s_tile), lambda b, t: (b, 0, t)),
        ),
        compiler_params=pltpu.CompilerParams(
            dimension_semantics=("parallel", "parallel"),
            vmem_limit_bytes=vmem_limit,
        ),
    )(x_t, w_pat, g)

    out = jnp.transpose(out_t[:, :, :S], (0, 2, 1))            # (B, S, C)
    return out, w_norm


def enet_simple_reference(x, weight):
    """Pure-JAX reference mirroring the torch code line by line (eval path)."""
    B, S, C, F = x.shape
    base_functions = x
    w = jnp.broadcast_to(weight[None, :], (S, weight.shape[0]))
    w = w.reshape(B, S, -1)
    w_norm = jax.nn.softmax(w, axis=-1)
    w_norm = w_norm.reshape(B, S, C, F)
    out = (base_functions * w_norm).sum(axis=-1)
    return out, w_norm


def _check(B, S, C, F, seed, **fwd_kwargs):
    key = jax.random.PRNGKey(seed)
    kx, kw = jax.random.split(key)
    x = jax.random.normal(kx, (B, S, C, F), dtype=jnp.float32)
    weight = jax.random.normal(kw, (B * C * F,), dtype=jnp.float32)

    out, w_norm = enet_simple_forward(x, weight, **fwd_kwargs)
    out = jax.block_until_ready(out)
    w_norm = jax.block_until_ready(w_norm)

    ref_out, ref_wn = enet_simple_reference(x, weight)
    np.testing.assert_allclose(np.asarray(out), np.asarray(ref_out),
                               rtol=1e-5, atol=1e-5)
    np.testing.assert_allclose(np.asarray(w_norm), np.asarray(ref_wn),
                               rtol=1e-5, atol=1e-5)
    assert out.shape == (B, S, C)
    assert w_norm.shape == (B, S, C, F)


if __name__ == "__main__":
    # Shapes consistent with the module's forward:
    # batch=2, num_samples=8, num_classes=4, num_base_functions=16
    # (output_dim must equal batch*classes*base_functions = 128).
    _check(B=2, S=8, C=4, F=16, seed=0)

    # Multi-tile + padded-S path: a small VMEM budget forces s_tile=128, so
    # S=300 gives 3 sample tiles with lane padding in the last one.
    _check(B=2, S=300, C=4, F=16, seed=1, vmem_budget_bytes=140_000)

    print("KERNEL_OK")
</pallas_src>

<mosaic_0001>
module attributes {stable_mosaic.version = 11 : i64} {
  func.func @_enet_simple_kernel(%arg0: i32, %arg1: i32, %arg2: memref<1x64x128xf32, #tpu.memory_space<vmem>>, %arg3: memref<1x64x128xf32, #tpu.memory_space<vmem>>, %arg4: memref<4x64xf32, #tpu.memory_space<vmem>>, %arg5: memref<1x4x128xf32, #tpu.memory_space<vmem>>) attributes {dimension_semantics = [#tpu.dimension_semantics<parallel>, #tpu.dimension_semantics<parallel>], iteration_bounds = array<i64: 2, 1>, scalar_prefetch = 0 : i64, scratch_operands = 0 : i64, tpu.core_type = #tpu.core_type<tc>, window_params = [{transform_indices = @transform_0, window_bounds = array<i64: 1, 64, 128>}, {transform_indices = @transform_1, window_bounds = array<i64: 1, 64, 128>}, {pipeline_mode = #tpu.pipeline_mode<synchronous>, transform_indices = @transform_2, window_bounds = array<i64: 4, 64>}, {transform_indices = @transform_3, window_bounds = array<i64: 1, 4, 128>}]} {
    %c0 = arith.constant 0 : index
    %c0_0 = arith.constant 0 : index
    %c0_1 = arith.constant 0 : index
    %0 = vector.load %arg2[%c0, %c0_0, %c0_1] : memref<1x64x128xf32, #tpu.memory_space<vmem>>, vector<1x64x128xf32>
    %1 = vector.shape_cast %0 : vector<1x64x128xf32> to vector<64x128xf32>
    %c0_2 = arith.constant 0 : index
    %c0_3 = arith.constant 0 : index
    %c0_4 = arith.constant 0 : index
    %2 = vector.load %arg3[%c0_2, %c0_3, %c0_4] : memref<1x64x128xf32, #tpu.memory_space<vmem>>, vector<1x64x128xf32>
    %3 = vector.shape_cast %2 : vector<1x64x128xf32> to vector<64x128xf32>
    %4 = arith.mulf %1, %3 : vector<64x128xf32>
    %c0_5 = arith.constant 0 : index
    %c0_6 = arith.constant 0 : index
    %5 = vector.load %arg4[%c0_5, %c0_6] : memref<4x64xf32, #tpu.memory_space<vmem>>, vector<4x64xf32>
    %cst = arith.constant dense<0.000000e+00> : vector<4x128xf32>
    %6 = tpu.matmul %5, %4, %cst {dimension_numbers = #tpu.dot_dimension_numbers<[1], [0], [0], [1], [0, 0, 1, 1], [], []>} : vector<4x64xf32>, vector<64x128xf32>, vector<4x128xf32> -> vector<4x128xf32>
    %c0_7 = arith.constant 0 : index
    %c0_8 = arith.constant 0 : index
    %c0_9 = arith.constant 0 : index
    %7 = vector.load %arg5[%c0_7, %c0_8, %c0_9] : memref<1x4x128xf32, #tpu.memory_space<vmem>>, vector<1x4x128xf32>
    %8 = vector.shape_cast %7 : vector<1x4x128xf32> to vector<4x128xf32>
    %9 = vector.shape_cast %6 : vector<4x128xf32> to vector<1x4x128xf32>
    tpu.vector_store %arg5[%c0_7, %c0_8, %c0_9], %9 {strides = array<i32>} : memref<1x4x128xf32, #tpu.memory_space<vmem>>, vector<1x4x128xf32>,
    return
  }
  func.func @transform_0(%arg0: i32, %arg1: i32) -> (i32, i32, i32) {
    %c0_i32 = arith.constant 0 : i32
    %c0_i32_0 = arith.constant 0 : i32
    return %arg0, %c0_i32, %arg1 : i32, i32, i32
  }
  func.func @transform_1(%arg0: i32, %arg1: i32) -> (i32, i32, i32) {
    %c0_i32 = arith.constant 0 : i32
    %c0_i32_0 = arith.constant 0 : i32
    %c0_i32_1 = arith.constant 0 : i32
    return %arg0, %c0_i32, %c0_i32_0 : i32, i32, i32
  }
  func.func @transform_2(%arg0: i32, %arg1: i32) -> (i32, i32) {
    %c0_i32 = arith.constant 0 : i32
    %c0_i32_0 = arith.constant 0 : i32
    %c0_i32_1 = arith.constant 0 : i32
    return %c0_i32, %c0_i32_0 : i32, i32
  }
  func.func @transform_3(%arg0: i32, %arg1: i32) -> (i32, i32, i32) {
    %c0_i32 = arith.constant 0 : i32
    %c0_i32_0 = arith.constant 0 : i32
    return %arg0, %c0_i32, %arg1 : i32, i32, i32
  }
}

</mosaic_0001>

<bundles_post_ra>
// kernel: tpu_custom_call.1
= control target key start
LH: loop header
LB: loop body
LE: loop exit
PB: predicated region body
PF: predicated region fallthrough
CT: control target
= control target key end

     0   :  { %8 = vsyncpa [#allocation3], 0  ;;  %s1032_s0 = inlined_call_operand.hbm [shape: f32[2,64,128], index: 0, kind: input, shape index: {}]   ;;  %s1033_s1 = inlined_call_operand.hbm [shape: f32[2,64,128], index: 1, kind: input, shape index: {}]   ;;  %s1034_s2 = inlined_call_operand.vmem [shape: f32[4,64], index: 2, kind: input, shape index: {}]   ;;  %s1035_s3 = inlined_call_operand.hbm [shape: f32[2,4,128], index: 3, kind: output, shape index: {}]  }
   0x1   :  { %10 = vsyncpa [#allocation3 + $0x1], 0 }
   0x2   :  { %11 = vsyncpa [#allocation6], 0 }
   0x3   :  { %13 = vsyncpa [#allocation6 + $0x1], 0 }
   0x4   :  { %14 = vsyncpa [#allocation4], 0 }
   0x5   :  { %16 = vsyncpa [#allocation4 + $0x1], 0  ;;  %s774_s12 = smov 0   ;;  %s776_s13 = smov 0  }
   0x6   :  { %s778_s14 = smov 0   ;;  %s780_s15 = smov 0  }
   0x7   :  { %s782_s16 = smov 0   ;;  %s784_s17 = smov 0  }
   0x8 LB: > { %s465_s18 = sadd.s32 4294967295, %s744_s17   ;;  %s466_s19 = sadd.s32 4294967294, %s744_s17   ;;  %s744_s17 = sphi %s784_s17, %s22_s17   ;;  %s740_s16 = sphi %s782_s16, %s1053_s16   ;;  %s736_s15 = sphi %s780_s15, %s1052_s15   ;;  %s732_s14 = sphi %s778_s14, %s1051_s14   ;;  %s728_s13 = sphi %s776_s13, %s1050_s13   ;;  %s724_s12 = sphi %s774_s12, %s1049_s12  }
   0x9   : > { %s34_s20 = sadd.s32 1, %s740_s16  ;;  %s43_s21 = sadd.s32 1, %s732_s14 }
   0xa   : > { %p36_p0 = scmp.ge.s32.totalorder %s34_s20, 2  ;;  %p50_p1 = scmp.ne.s32.totalorder %s732_s14, %s728_s13 }
   0xb   : > { %p51_p2 = scmp.eq.s32.totalorder %s744_s17, 0  ;;  %p56_p3 = scmp.ne.s32.totalorder %s728_s13, %s724_s12 }
   0xc   : > { %s1055_s20 = smov (%p36_p0, %s34_s20), 0  ;;  %p57_p5 = scmp.eq.s32.totalorder %s465_s18, 0 }
   0xd   : > { %p815_p4 = por %p51_p2, %p50_p1  ;;  %s38_s23 = ssub.s32 %s740_s16, %s1055_s20 }
   0xe   : > { %p129_p6 = scmp.eq.s32.totalorder %s465_s18, 1  ;;  %p41_p7 = scmp.eq.s32.totalorder %s38_s23, 0 }
   0xf   : > { %p821_p8 = por %p57_p5, %p56_p3  ;;  %p135_p10 = scmp.eq.s32.totalorder %s466_s19, 1 }
  0x10   : > { %p825_p9 = por %p129_p6, %p50_p1  ;;  %p543_p13 = scmp.lt.s32.totalorder %s744_s17, 2 }
  0x11   : > { %s1039_s24 = scalar_select %p821_p8, 1, 0 }
  0x12   : > { %s1040_s25 = scalar_select %p825_p9, 1, 0 }
  0x13   : > { %s830_s26 = scalar_select %p41_p7, %s732_s14, %s43_s21  }
  0x14   : > { %p832_p11 = por %p135_p10, %p56_p3  ;;  %s839_s28 = sand.u32 1, %s732_s14  }
  0x15   : > { %s469_s29 = sshll.u32 %s839_s28, 6  ;;  %s484_s30 = sshll.u32 %s740_s16, 10 }
  0x16   : > { %s1041_s27 = scalar_select %p832_p11, 1, 0 }
  0x17   : > { %s848_s6 = scalar_lea.hbm %s1032_s0, %s484_s30  ;;  %s162_s7 = scalar_lea.vmem [#allocation2], %s469_s29 }
  0x18   : > { %s170_s8 = sshll.u32 %s162_s7, 4  ;;  %p856_p0 = pnand %p543_p13, %p815_p4  ;;  %s852_s8 = int_to_ptr.vmem [resolvable:$true] %s170_s8 }
  0x19   : > { %s159_s10 = scalar_lea.sflag [#allocation3], %s839_s28  ;;  %s598_s11 = scalar_lea.hbm %s848_s6, 1024 }
  0x1a   : > { %p599_p2 = scmp.ne.s32.totalorder %s848_s6, %s598_s11  ;;  %p600_p3 = pneg %p856_p0 }
  0x1b   : > { %s603_s21 = scalar_lea.hbm %s1032_s0, 2048  ;;  %p604_p4 = scmp.lt.u32.totalorder %s848_s6, %s1032_s0 }
  0x1c   : > { %p601_p5 = pnand %p600_p3, %p599_p2  ;;  %p605_p7 = scmp.lt.u32.totalorder %s603_s21, %s598_s11 }
  0x1d   : > { %p607_p13 = scmp.lt.u32.totalorder %s598_s11, %s848_s6 }
  0x1e   : > { %p602_p6 = pneg %p601_p5  ;;  %p606_p10 = por %p605_p7, %p604_p4 }
  0x20   : > { %p608_p12 = por %p607_p13, %p606_p10 }
  0x22   : > { %p609_p1 = pnand %p608_p12, %p602_p6 }
  0x24   : > { %612 = shalt.err (!%p609_p1)
}
  0x25   : > { %s613_s4 = scalar_lea.vmem %s852_s8, 1024  ;;  %s746_s5 = smov [#allocation2]  }
  0x26   : > { %p614_p2 = scmp.ne.s32.totalorder %s852_s8, %s613_s4  ;;  %s618_s7 = sshll.u32 %s746_s5, 4  ;;  %s619_s7 = int_to_ptr.vmem [resolvable:$false] %s618_s7 }
  0x27   : > { %s620_s18 = scalar_lea.vmem %s619_s7, 2048  ;;  %p621_p9 = scmp.lt.s32.totalorder %s852_s8, %s619_s7 }
  0x28   : > { %p616_p5 = pnand %p614_p2, %p600_p3  ;;  %p622_p4 = scmp.lt.s32.totalorder %s620_s18, %s613_s4 }
  0x2a   : > { %p617_p11 = pneg %p616_p5  ;;  %p623_p7 = por %p622_p4, %p621_p9 }
  0x2c   : > { %p624_p10 = pnand %p623_p7, %p617_p11 }
  0x2e   : > { %627 = shalt.err (!%p624_p10)
}
  0x2f   : > { %s747_s11 = smov 128   ;;  %s748_s19 = smov 8  }
  0x30   : > { %535 = dma.hbm_to_vmem [thread:$0]  (!%p856_p0), %s848_s6, 1024, %s852_s8, %s159_s10, %s747_s11, %s747_s11, %s748_s19  }
  0x31   : > { %p199_p9 = scmp.lt.s32.totalorder %s744_s17, 3  ;;  %s898_s23 = scalar_lea.hbm %s1033_s1, %s484_s30 }
  0x32   : > { %p1043_p11 = scmp.ge.s32.totalorder %s744_s17, 1  ;;  %s184_s5 = scalar_lea.vmem [#allocation5], %s469_s29 }
  0x33   : > { %s191_s7 = sshll.u32 %s184_s5, 4  ;;  %s181_s6 = scalar_lea.sflag [#allocation6], %s839_s28  ;;  %s908_s7 = int_to_ptr.vmem [resolvable:$true] %s191_s7 }
  0x34   : > { %p902_p12 = pnand %p1043_p11, %p199_p9  ;;  %s628_s8 = scalar_lea.hbm %s898_s23, 1024 }
  0x35   : > { %p629_p1 = scmp.ne.s32.totalorder %s898_s23, %s628_s8  ;;  %s633_s18 = scalar_lea.hbm %s1033_s1, 2048 }
  0x36   : > { %p634_p2 = scmp.lt.u32.totalorder %s898_s23, %s1033_s1  ;;  %p635_p5 = scmp.lt.u32.totalorder %s633_s18, %s628_s8 }
  0x37   : > { %p631_p6 = pnand %p629_p1, %p600_p3  ;;  %p637_p7 = scmp.lt.u32.totalorder %s628_s8, %s898_s23 }
  0x38   : > { %p636_p4 = por %p635_p5, %p634_p2 }
  0x39   : > { %p632_p13 = pneg %p631_p6 }
  0x3a   : > { %p638_p10 = por %p637_p7, %p636_p4 }
  0x3c   : > { %p639_p9 = pnand %p638_p10, %p632_p13 }
  0x3e   : > { %642 = shalt.err (!%p639_p9)
}
  0x3f   : > { %s643_s29 = scalar_lea.vmem %s908_s7, 1024  ;;  %s749_s5 = smov [#allocation5]  }
  0x40   : > { %p644_p11 = scmp.ne.s32.totalorder %s908_s7, %s643_s29  ;;  %s648_s30 = sshll.u32 %s749_s5, 4  ;;  %s649_s30 = int_to_ptr.vmem [resolvable:$false] %s648_s30 }
  0x41   : > { %s650_s10 = scalar_lea.vmem %s649_s30, 2048  ;;  %p651_p8 = scmp.lt.s32.totalorder %s908_s7, %s649_s30 }
  0x42   : > { %p646_p1 = pnand %p644_p11, %p600_p3  ;;  %p652_p2 = scmp.lt.s32.totalorder %s650_s10, %s643_s29 }
  0x44   : > { %p647_p6 = pneg %p646_p1  ;;  %p653_p5 = por %p652_p2, %p651_p8 }
  0x46   : > { %p654_p4 = pnand %p653_p5, %p647_p6 }
  0x48   : > { %657 = shalt.err (!%p654_p4)
}
  0x49   : > { %538 = dma.hbm_to_vmem [thread:$0]  (!%p856_p0), %s898_s23, 1024, %s908_s7, %s181_s6, %s747_s11, %s747_s11, %s748_s19  }
  0x4a   : > { %203 = sbr.rel (%p902_p12) target bundleno = 331 (0x14b), region = 32  ;;  %s942_s8 = sand.u32 (!%p902_p12), 1, %s728_s13  }
  0x4b   : > { %s476_s18 = sshll.u32 (!%p902_p12), %s942_s8, 6  ;;  %s206_s21 = scalar_lea.sflag (!%p902_p12), [#allocation3], %s942_s8 }
  0x4c   : > { %s946_s9 = scalar_lea.vmem (!%p902_p12), [#allocation2], %s476_s18  ;;  %p1045_p8 = scmp.ne.s32.totalorder (!%p902_p12), %s1039_s24, 0 }
  0x51   : > { %711 = dma.done.wait (%p1045_p8), %s206_s21, 1024  }
  0x52   : > { %713 = vsyncadd (%p1045_p8), %s206_s21, 4294966272  ;;  %s215_s28 = scalar_lea.sflag [#allocation6], %s942_s8  ;;  %s953_s11 = scalar_lea.vmem [#allocation5], %s476_s18 }
  0x53   : > { %715 = dma.done.wait (%p1045_p8), %s215_s28, 1024  }
  0x54   : > { %717 = vsyncadd (%p1045_p8), %s215_s28, 4294966272  ;;  %v750_v0 = vmov 0.0|0.0   ;;  %vm751_vm0 = vmmov 0   ;;  %v752_v1 = vmov 0.0   ;;  %v246_v2 = vld [vmem:[%s946_s9] sm:$0xff]  ;;  %v247_v3 = vld [vmem:[%s946_s9 + $0x8] sm:$0xff] }
  0x55   : > { %514 = vmatprep.subr.bf16.mxu0 %v750_v0  ;;  %511 = vmatprep.mubr.msk.f32.mxu0 %vm751_vm0, %v752_v1  ;;  %v254_v4 = vld [vmem:[%s953_s11] sm:$0xff]  ;;  %v255_v5 = vld [vmem:[%s953_s11 + $0x8] sm:$0xff]  ;;  %v248_v7 = vld [vmem:[%s946_s9 + $0x10] sm:$0xff]  ;;  %vm271_vm1 = vcmask 523264   ;;  %s478_s23 = sshll.u32 %s942_s8, 2  ;;  %s481_s6 = sshll.u32 %s736_s15, 6 }
  0x56   : > { %v262_v6 = vmul.f32 %v254_v4, %v246_v2  ;;  %v249_v8 = vld [vmem:[%s946_s9 + $0x18] sm:$0xff]  ;;  %v263_v9 = vmul.f32 %v255_v5, %v247_v3  ;;  %v256_v10 = vld [vmem:[%s953_s11 + $0x10] sm:$0xff]  ;;  %v250_v12 = vld [vmem:[%s946_s9 + $0x20] sm:$0xff]  ;;  %s245_s4 = scalar_lea.vmem [#allocation7], %s478_s23  ;;  %s985_s5 = scalar_lea.hbm %s1035_s3, %s481_s6 }
  0x57   : > { %v257_v11 = vld [vmem:[%s953_s11 + $0x18] sm:$0xff]  ;;  %v264_v13 = vmul.f32 %v256_v10, %v248_v7  ;;  %v251_v15 = vld [vmem:[%s946_s9 + $0x28] sm:$0xff]  ;;  %v258_v16 = vld [vmem:[%s953_s11 + $0x20] sm:$0xff]  ;;  %s361_s7 = sshll.u32 %s245_s4, 4  ;;  %s347_s30 = scalar_lea.sflag [#allocation4], %s942_s8  ;;  %s980_s7 = int_to_ptr.vmem [resolvable:$true] %s361_s7 }
  0x58   : > { %v265_v14 = vmul.f32 %v257_v11, %v249_v8  ;;  %v259_v17 = vld [vmem:[%s953_s11 + $0x28] sm:$0xff]  ;;  %v515_v18 = vpack.c.bf16 %v263_v9, %v262_v6  ;;  %v266_v20 = vmul.f32 %v258_v16, %v250_v12  ;;  %v252_v22 = vld [vmem:[%s946_s9 + $0x30] sm:$0xff]  ;;  %v253_v23 = vld [vmem:[%s946_s9 + $0x38] sm:$0xff]  ;;  %s658_s10 = scalar_lea.vmem %s980_s7, 64  ;;  %p1046_p3 = scmp.ne.s32.totalorder %s1040_s25, 0 }
  0x59   : > { %v267_v21 = vmul.f32 %v259_v17, %v251_v15  ;;  %v260_v24 = vld [vmem:[%s953_s11 + $0x30] sm:$0xff]  ;;  %v261_v25 = vld [vmem:[%s953_s11 + $0x38] sm:$0xff]  ;;  %v270_v30 = vld [vmem:[%s1034_s2] sm:$0xf]  ;;  %p659_p0 = scmp.ne.s32.totalorder %s980_s7, %s658_s10  ;;  %s753_s15 = smov [#allocation7]  }
  0x5a   : > { %516 = vmatpush3.bf16.msra.mxu0 %v515_v18  ;;  %v518_v19 = vpack.c.bf16 %v265_v14, %v264_v13  ;;  %v268_v27 = vmul.f32 %v260_v24, %v252_v22  ;;  %v269_v28 = vmul.f32 %v261_v25, %v253_v23  ;;  %s662_s18 = sshll.u32 %s753_s15, 4  ;;  %s663_s18 = int_to_ptr.vmem [resolvable:$false] %s662_s18 }
  0x5b   : > { %517 = vmatprep.subr.bf16.mxu0 %v750_v0  ;;  %v521_v26 = vpack.c.bf16 %v267_v21, %v266_v20  ;;  %p660_p12 = pnand %p659_p0, %p1046_p3  ;;  %s664_s21 = scalar_lea.vmem %s663_s18, 128 }
  0x5c   : > { %v524_v29 = vpack.c.bf16 %v269_v28, %v268_v27  ;;  %p665_p7 = scmp.lt.s32.totalorder %s980_s7, %s663_s18  ;;  %p666_p10 = scmp.lt.s32.totalorder %s664_s21, %s658_s10 }
  0x5d   : > { %p661_p13 = pneg %p660_p12 }
  0x5e   : > { %519 = vmatpush3.bf16.msra.mxu0 %v518_v19  ;;  %p667_p9 = por %p666_p10, %p665_p7 }
  0x5f   : > { %520 = vmatprep.subr.bf16.mxu0 %v750_v0 }
  0x60   : > { %p668_p11 = pnand %p667_p9, %p661_p13 }
  0x62   : > { %522 = vmatpush3.bf16.msra.mxu0 %v521_v26 }
  0x63   : > { %523 = vmatprep.subr.bf16.mxu0 %v750_v0 }
  0x66   : > { %525 = vmatpush3.bf16.msra.mxu0 %v524_v29 }
  0x69   : > { %512 = vmatmul.mubr.msk.f32.vlgmr.msra.gmra.mrb[0].mxu0 %vm271_vm1, %v270_v30 }
 0x13c   : > { %v341_v31 = vpop.f32.mrb[0].mxu0 }
 0x13d   : > { %345 = vst [vmem:[%s245_s4] sm:$0xf] %v341_v31  ;;  %v513_v32 = vpop.f32.mrb[1].mxu0 }
 0x13e   : > { %671 = shalt.err (!%p668_p11)
}
 0x13f   : > { %s672_s8 = scalar_lea.hbm %s985_s5, 64  ;;  %s676_s11 = scalar_lea.hbm %s1035_s3, 128 }
 0x140   : > { %p673_p1 = scmp.ne.s32.totalorder %s985_s5, %s672_s8  ;;  %p677_p5 = scmp.lt.u32.totalorder %s985_s5, %s1035_s3 }
 0x141   : > { %p678_p4 = scmp.lt.u32.totalorder %s676_s11, %s672_s8  ;;  %p680_p0 = scmp.lt.u32.totalorder %s672_s8, %s985_s5 }
 0x142   : > { %p674_p6 = pnand %p673_p1, %p1046_p3 }
 0x143   : > { %p679_p8 = por %p678_p4, %p677_p5 }
 0x144   : > { %p675_p2 = pneg %p674_p6 }
 0x145   : > { %p681_p12 = por %p680_p0, %p679_p8 }
 0x147   : > { %p682_p13 = pnand %p681_p12, %p675_p2 }
 0x149   : > { %685 = shalt.err (!%p682_p13)
}
 0x14a   : > { %530 = dma.vmem_to_hbm [thread:$0]  (%p1046_p3), %s980_s7, 64, %s985_s5, %s347_s30  }
 0x14b PF: > { %s373_s23 = sand.u32 1, %s724_s12   ;;  %p1047_p7 = scmp.ne.s32.totalorder %s1041_s27, 0 }
 0x14c   : > { %p1048_p10 = scmp.ge.s32.totalorder %s744_s17, 2  ;;  %s374_s4 = scalar_lea.sflag [#allocation4], %s373_s23 }
 0x14e   : > { %p540_p9 = pnand %p1048_p10, %p1047_p7 }
 0x150   : > { %719 = dma.done.wait (!%p540_p9), %s374_s4, 64  }
 0x151   : > { %721 = vsyncadd (!%p540_p9), %s374_s4, 4294967232  ;;  %s22_s17 = sadd.s32 1, %s744_s17   ;;  %s1049_s12 = smov %s728_s13 }
 0x152   : > { %p19_p11 = scmp.ge.s32.totalorder %s22_s17, 4   ;;  %s1050_s13 = smov %s732_s14 }
 0x153   : > { %s1051_s14 = smov %s830_s26  ;;  %s1052_s15 = smov %s740_s16 }
 0x154   : > { %s1053_s16 = smov %s1055_s20  ;;  %21 = sbr.rel (!%p19_p11) target bundleno = 8 (0x8), region = 90 }
 0x15b   :  { %379 = vsyncpa [#allocation3], 1 }
 0x15c   :  { %381 = vsyncpa [#allocation3 + $0x1], 1 }
 0x15d   :  { %382 = vsyncpa [#allocation6], 1 }
 0x15e   :  { %384 = vsyncpa [#allocation6 + $0x1], 1 }
 0x15f   :  { %385 = vsyncpa [#allocation4], 1 }
 0x160   :  { %387 = vsyncpa [#allocation4 + $0x1], 1 }

</bundles_post_ra>
